<compile_context>
chip_gen: v7x
topology: tpu7x:2x2x1
jax: 0.10.0
libtpu: 0.0.40
codegen_flags: <defaults>
</compile_context>

<pallas_src>
import math

import jax
import jax.numpy as jnp
from jax.experimental import pallas as pl
from jax.experimental.pallas import tpu as pltpu


def _round_up(x, n):
    return ((x + n - 1) // n) * n


def _vmem_capacity_bytes():
    """Per-TensorCore VMEM capacity; conservative 64 MiB (v7x) fallback."""
    try:
        cap = getattr(pltpu.get_tpu_info(), "vmem_capacity_bytes", None)
        if cap:
            return int(cap)
    except Exception:
        pass
    return 64 * 1024 * 1024


def _lowrank_kernel(x_ref, w1t_ref, w2t_ref, b_ref, o_ref):
    # Cast the x tile in VMEM (free under the DMA); no wrapper-side astype pass.
    x = x_ref[...].astype(w1t_ref.dtype)
    # h = x @ W1^T -> (TM, rank_p); f32 accumulation on the MXU.
    h = jnp.dot(x, w1t_ref[...], preferred_element_type=jnp.float32)
    # y = h @ W2^T + b2; h and W2^T stay f32 (hidden under DMA, tighter accuracy).
    y = jnp.dot(h, w2t_ref[...], preferred_element_type=jnp.float32) + b_ref[...]
    o_ref[...] = y.astype(o_ref.dtype)


def low_rank_linear(x, w1, w2, b2, *, compute_dtype=None):
    """Forward pass of LowRankLinear.

    x:  (..., in_features)
    w1: (rank, in_features)      (low1.weight)
    w2: (out_features, rank)     (low2.weight)
    b2: (out_features,)          (low2.bias)
    compute_dtype: dtype fed to the *first* MXU pass (x tile is cast in-kernel,
      W1^T is stored in this dtype).  Real HBM savings only occur when x is
      already stored in this dtype upstream; valid on v5e/v6e/v7x alike.
      Accumulation, the second matmul, and the bias add are always f32.
    """
    *lead, in_features = x.shape
    rank = w1.shape[0]
    out_features = w2.shape[0]
    m = int(math.prod(lead)) if lead else 1

    out_dtype = x.dtype
    cd = jnp.dtype(compute_dtype) if compute_dtype is not None else jnp.dtype(x.dtype)

    # ---- resident weights: rank zero-padded to a lane-dense multiple of 128 ----
    rank_p = _round_up(rank, 128)
    w1t = w1.T                                                  # (in_f, rank)
    w2t = w2.T.astype(jnp.float32)                              # (rank, out_f)
    if rank_p != rank:
        w1t = jnp.pad(w1t, ((0, 0), (0, rank_p - rank)))        # zero columns
        w2t = jnp.pad(w2t, ((0, rank_p - rank), (0, 0)))        # zero rows
    w1t = w1t.astype(cd)
    b = b2.astype(jnp.float32).reshape(1, out_features)

    # No padding / dtype pass over x: reshape of leading dims is layout-free.
    x2d = x.reshape(m, in_features)

    x_bytes = jnp.dtype(x.dtype).itemsize
    out_bytes = jnp.dtype(out_dtype).itemsize

    # ---- TM from a VMEM byte budget (generation-aware) -------------------------
    cap = _vmem_capacity_bytes()
    budget = int(0.75 * cap)                     # headroom for Mosaic scratch

    def usage_bytes(t):
        return (2 * t * in_features * x_bytes    # x tile, double-buffered
                + 2 * t * out_features * out_bytes   # out tile, double-buffered
                + in_features * rank_p * 4       # W1^T resident (<= f32)
                + rank_p * out_features * 4      # W2^T resident (f32)
                + out_features * 4               # bias resident
                + t * rank_p * 4                 # h intermediate (f32)
                + t * out_features * 4)          # y intermediate (f32)

    tm = (4 << 20) // max(1, in_features * x_bytes)   # ~4 MiB x tile target
    tm = max(8, min(tm, 4096))
    tm = (tm // 8) * 8
    while tm > 8 and usage_bytes(tm) > budget:
        tm = max(8, ((tm // 2) // 8) * 8)

    if m <= 8:
        tm = m                                   # single full-extent block
    else:
        tm = min(tm, (m // 8) * 8)               # multiple of 8, <= m
        half = ((m // 2) // 8) * 8               # >= 2 grid steps (v7x megacore)
        if half >= 8:
            tm = min(tm, half)
    tm = max(tm, 1)

    grid = (pl.cdiv(m, tm),)

    usage = usage_bytes(tm)
    vmem_limit = int(min(0.9 * cap, max(2 * usage + (2 << 20), 16 << 20)))

    cost = pl.CostEstimate(
        flops=2 * m * in_features * rank_p + 2 * m * rank_p * out_features,
        transcendentals=0,
        bytes_accessed=(m * in_features * x_bytes
                        + m * out_features * out_bytes
                        + in_features * rank_p * jnp.dtype(cd).itemsize
                        + rank_p * out_features * 4
                        + out_features * 4),
    )

    out = pl.pallas_call(
        _lowrank_kernel,
        out_shape=jax.ShapeDtypeStruct((m, out_features), out_dtype),
        grid=grid,
        in_specs=[
            pl.BlockSpec((tm, in_features), lambda i: (i, 0)),      # x tile
            pl.BlockSpec((in_features, rank_p), lambda i: (0, 0)),  # W1^T resident
            pl.BlockSpec((rank_p, out_features), lambda i: (0, 0)), # W2^T resident
            pl.BlockSpec((1, out_features), lambda i: (0, 0)),      # bias resident
        ],
        out_specs=pl.BlockSpec((tm, out_features), lambda i: (i, 0)),
        compiler_params=pltpu.CompilerParams(
            dimension_semantics=("parallel",),
            vmem_limit_bytes=vmem_limit,
        ),
        cost_estimate=cost,
    )(x2d, w1t, w2t, b)

    return out.reshape(*lead, out_features)

    # TODO(synk): init_pretrained (SVD-based parameter init) is host-side
    # parameter setup, not part of the forward pass, so it is not a kernel.


def init_params(key, in_features, rank, out_features, dtype=jnp.float32):
    """Deterministic init mimicking torch nn.Linear default U[-1/sqrt(fan_in), ...]."""
    k1, k2, k3 = jax.random.split(key, 3)
    bound1 = 1.0 / math.sqrt(in_features)
    bound2 = 1.0 / math.sqrt(rank)
    w1 = jax.random.uniform(k1, (rank, in_features), dtype, -bound1, bound1)
    w2 = jax.random.uniform(k2, (out_features, rank), dtype, -bound2, bound2)
    b2 = jax.random.uniform(k3, (out_features,), dtype, -bound2, bound2)
    return w1, w2, b2


if __name__ == "__main__":
    key = jax.random.PRNGKey(0)
    kx, kp = jax.random.split(key)

    batch, seq, in_features = 2, 8, 32
    rank, out_features = 4, 16

    x = jax.random.normal(kx, (batch, seq, in_features), jnp.float32)
    w1, w2, b2 = init_params(kp, in_features, rank, out_features)

    # Pure-JAX reference of the same math.
    y_ref = (x @ w1.T) @ w2.T + b2

    # Full-precision path: exact check.
    y = low_rank_linear(x, w1, w2, b2)
    y = jax.block_until_ready(y)
    assert y.shape == (batch, seq, out_features)
    assert jnp.allclose(y, y_ref, atol=1e-5, rtol=1e-5)

    # bf16 first-matmul path (HBM win when x is stored bf16 upstream; works on
    # v5e as well).  Only x/W1 are quantized -- h and W2 stay f32 -- so the
    # tolerance is tighter than before.
    y_bf16 = low_rank_linear(x, w1, w2, b2, compute_dtype=jnp.bfloat16)
    y_bf16 = jax.block_until_ready(y_bf16)
    assert y_bf16.shape == (batch, seq, out_features)
    assert jnp.allclose(y_bf16, y_ref, atol=3e-2, rtol=3e-2)

    print("KERNEL_OK")
</pallas_src>

<mosaic_0001>
module attributes {stable_mosaic.version = 11 : i64} {
  func.func @_lowrank_kernel(%arg0: i32, %arg1: memref<8x32xf32, #tpu.memory_space<vmem>>, %arg2: memref<32x128xf32, #tpu.memory_space<vmem>>, %arg3: memref<128x16xf32, #tpu.memory_space<vmem>>, %arg4: memref<1x16xf32, #tpu.memory_space<vmem>>, %arg5: memref<8x16xf32, #tpu.memory_space<vmem>>) attributes {dimension_semantics = [#tpu.dimension_semantics<parallel>], iteration_bounds = array<i64: 2>, scalar_prefetch = 0 : i64, scratch_operands = 0 : i64, tpu.core_type = #tpu.core_type<tc>, window_params = [{transform_indices = @transform_0, window_bounds = array<i64: 8, 32>}, {pipeline_mode = #tpu.pipeline_mode<synchronous>, transform_indices = @transform_1, window_bounds = array<i64: 32, 128>}, {pipeline_mode = #tpu.pipeline_mode<synchronous>, transform_indices = @transform_2, window_bounds = array<i64: 128, 16>}, {pipeline_mode = #tpu.pipeline_mode<synchronous>, transform_indices = @transform_3, window_bounds = array<i64: 1, 16>}, {transform_indices = @transform_4, window_bounds = array<i64: 8, 16>}]} {
    %c0 = arith.constant 0 : index
    %c0_0 = arith.constant 0 : index
    %0 = vector.load %arg1[%c0, %c0_0] : memref<8x32xf32, #tpu.memory_space<vmem>>, vector<8x32xf32>
    %c0_1 = arith.constant 0 : index
    %c0_2 = arith.constant 0 : index
    %1 = vector.load %arg2[%c0_1, %c0_2] : memref<32x128xf32, #tpu.memory_space<vmem>>, vector<32x128xf32>
    %cst = arith.constant dense<0.000000e+00> : vector<8x128xf32>
    %2 = tpu.matmul %0, %1, %cst {dimension_numbers = #tpu.dot_dimension_numbers<[1], [0], [0], [1], [0, 0, 1, 1], [], []>} : vector<8x32xf32>, vector<32x128xf32>, vector<8x128xf32> -> vector<8x128xf32>
    %c0_3 = arith.constant 0 : index
    %c0_4 = arith.constant 0 : index
    %3 = vector.load %arg3[%c0_3, %c0_4] : memref<128x16xf32, #tpu.memory_space<vmem>>, vector<128x16xf32>
    %cst_5 = arith.constant dense<0.000000e+00> : vector<8x16xf32>
    %4 = tpu.matmul %2, %3, %cst_5 {dimension_numbers = #tpu.dot_dimension_numbers<[1], [0], [0], [1], [0, 0, 1, 1], [], []>} : vector<8x128xf32>, vector<128x16xf32>, vector<8x16xf32> -> vector<8x16xf32>
    %c0_6 = arith.constant 0 : index
    %c0_7 = arith.constant 0 : index
    %5 = vector.load %arg4[%c0_6, %c0_7] : memref<1x16xf32, #tpu.memory_space<vmem>>, vector<1x16xf32>
    %6 = vector.broadcast %5 : vector<1x16xf32> to vector<8x16xf32>
    %7 = arith.addf %4, %6 : vector<8x16xf32>
    %c0_8 = arith.constant 0 : index
    %c0_9 = arith.constant 0 : index
    %8 = vector.load %arg5[%c0_8, %c0_9] : memref<8x16xf32, #tpu.memory_space<vmem>>, vector<8x16xf32>
    tpu.vector_store %arg5[%c0_8, %c0_9], %7 {strides = array<i32>} : memref<8x16xf32, #tpu.memory_space<vmem>>, vector<8x16xf32>,
    return
  }
  func.func @transform_0(%arg0: i32) -> (i32, i32) {
    %c0_i32 = arith.constant 0 : i32
    %c0_i32_0 = arith.constant 0 : i32
    return %arg0, %c0_i32 : i32, i32
  }
  func.func @transform_1(%arg0: i32) -> (i32, i32) {
    %c0_i32 = arith.constant 0 : i32
    %c0_i32_0 = arith.constant 0 : i32
    %c0_i32_1 = arith.constant 0 : i32
    return %c0_i32, %c0_i32_0 : i32, i32
  }
  func.func @transform_2(%arg0: i32) -> (i32, i32) {
    %c0_i32 = arith.constant 0 : i32
    %c0_i32_0 = arith.constant 0 : i32
    %c0_i32_1 = arith.constant 0 : i32
    return %c0_i32, %c0_i32_0 : i32, i32
  }
  func.func @transform_3(%arg0: i32) -> (i32, i32) {
    %c0_i32 = arith.constant 0 : i32
    %c0_i32_0 = arith.constant 0 : i32
    %c0_i32_1 = arith.constant 0 : i32
    return %c0_i32, %c0_i32_0 : i32, i32
  }
  func.func @transform_4(%arg0: i32) -> (i32, i32) {
    %c0_i32 = arith.constant 0 : i32
    %c0_i32_0 = arith.constant 0 : i32
    return %arg0, %c0_i32 : i32, i32
  }
}

</mosaic_0001>

<bundles_post_ra>
// kernel: tpu_custom_call.1
= control target key start
LH: loop header
LB: loop body
LE: loop exit
PB: predicated region body
PF: predicated region fallthrough
CT: control target
= control target key end

     0   :  { %9 = vsyncpa [#allocation3], 0  ;;  %s848_s0 = inlined_call_operand.vmem [shape: f32[16,32], index: 0, kind: input, shape index: {}]   ;;  %s849_s1 = inlined_call_operand.vmem [shape: f32[32,128], index: 1, kind: input, shape index: {}]   ;;  %s850_s2 = inlined_call_operand.vmem [shape: f32[128,16], index: 2, kind: input, shape index: {}]   ;;  %s851_s3 = inlined_call_operand.vmem [shape: f32[1,16], index: 3, kind: input, shape index: {}]   ;;  %s852_s4 = inlined_call_operand.hbm [shape: f32[16,16], index: 4, kind: output, shape index: {}]  }
   0x1   :  { %11 = vsyncpa [#allocation3 + $0x1], 0  ;;  %s685_s15 = smov 0   ;;  %s687_s16 = smov 0  }
   0x2   :  { %s689_s17 = smov 0   ;;  %s691_s18 = smov 0  }
   0x3 LB: > { %s706_s19 = sadd.s32 4294967295, %s654_s18   ;;  %s440_s20 = sadd.s32 4294967294, %s654_s18   ;;  %s654_s18 = sphi %s691_s18, %s858_s18   ;;  %s650_s17 = sphi %s689_s17, %s857_s17   ;;  %s646_s16 = sphi %s687_s16, %s856_s16   ;;  %s642_s15 = sphi %s685_s15, %s855_s15  }
   0x4   : > { %s710_s21 = sadd.s32 1, %s654_s18   ;;  %s113_s22 = sadd.s32 1, %s650_s17 }
   0x5   : > { %s110_s23 = ssub.s32 %s654_s18, %s710_s21  ;;  %p123_p0 = scmp.ne.s32.totalorder %s650_s17, %s646_s16 }
   0x6   : > { %p111_p1 = scmp.eq.s32.totalorder %s110_s23, 0  ;;  %p124_p2 = scmp.eq.s32.totalorder %s706_s19, 1 }
   0x7   : > { %p129_p3 = scmp.ne.s32.totalorder %s646_s16, %s642_s15  ;;  %p130_p4 = scmp.eq.s32.totalorder %s440_s20, 1 }
   0x8   : > { %s721_s24 = scalar_select %p111_p1, %s650_s17, %s113_s22  }
   0x9   : > { %p723_p5 = por %p124_p2, %p123_p0  ;;  %p727_p6 = por %p130_p4, %p129_p3 }
   0xa   : > { %p443_p7 = scmp.ge.s32.totalorder %s654_s18, 1  ;;  %p164_p8 = scmp.lt.s32.totalorder %s654_s18, 3 }
   0xc   : > { %p165_p9 = pnand %p443_p7, %p164_p8 }
   0xd   : > { %v194_v0 = vld [vmem:[%s849_s1] sm:$0xff] (!%p165_p9)  ;;  %v195_v1 = vld [vmem:[%s849_s1 + $0x8] sm:$0xff] (!%p165_p9)  ;;  %v196_v2 = vld [vmem:[%s849_s1 + $0x10] sm:$0xff] (!%p165_p9)  ;;  %v656_v3 = vmov (!%p165_p9), 0.0|0.0   ;;  %vm657_vm0 = vmmov (!%p165_p9), 0   ;;  %v658_v6 = vmov (!%p165_p9), 0.0  }
   0xe   : > { %168 = sbr.rel (%p165_p9) target bundleno = 466 (0x1d2), region = 36  ;;  %520 = vmatprep.subr.bf16.mxu0 (!%p165_p9), %v656_v3  ;;  %v521_v4 = vpack.c.bf16 (!%p165_p9), %v195_v1, %v194_v0  ;;  %v197_v5 = vld [vmem:[%s849_s1 + $0x18] sm:$0xff] (!%p165_p9)  ;;  %482 = vmatprep.mubr.msk.f32.mxu0 (!%p165_p9), %vm657_vm0, %v658_v6  ;;  %p189_p10 = scmp.lt.s32.totalorder (!%p165_p9), %s706_s19, 1  ;;  %v272_v7 = vld [vmem:[%s850_s2] sm:$0xff] (!%p165_p9)  ;;  %v273_v8 = vld [vmem:[%s850_s2 + $0x8] sm:$0xff] (!%p165_p9)  ;;  %vm198_vm1 = vcmask (!%p165_p9), 261120  }
   0xf   : > { %526 = vmatprep.subr.bf16.mxu1 (!%p165_p9), %v656_v3  ;;  %v527_v9 = vpack.c.bf16 (!%p165_p9), %v273_v8, %v272_v7  ;;  %v274_v10 = vld [vmem:[%s850_s2 + $0x10] sm:$0xff] (!%p165_p9)  ;;  %v275_v11 = vld [vmem:[%s850_s2 + $0x18] sm:$0xff] (!%p165_p9)  ;;  %517 = vmatprep.mubr.msk.f32.mxu1 (!%p165_p9), %vm657_vm0, %v658_v6  ;;  %v524_v12 = vpack.c.bf16 (!%p165_p9), %v197_v5, %v196_v2  ;;  %v276_v14 = vld [vmem:[%s850_s2 + $0x20] sm:$0xff] (!%p165_p9)  ;;  %s186_s12 = sand.u32 (!%p165_p9), 1, %s646_s16   ;;  %s449_s22 = sshll.u32 (!%p165_p9), %s706_s19, 7  ;;  %vm365_vm2 = vcmask (!%p165_p9), 130048  }
  0x10   : > { %522 = vmatpush3.bf16.msra.mxu0 (!%p165_p9), %v521_v4  ;;  %v530_v13 = vpack.c.bf16 (!%p165_p9), %v275_v11, %v274_v10  ;;  %v277_v15 = vld [vmem:[%s850_s2 + $0x28] sm:$0xff] (!%p165_p9)  ;;  %v278_v18 = vld [vmem:[%s850_s2 + $0x30] sm:$0xff] (!%p165_p9)  ;;  %v279_v19 = vld [vmem:[%s850_s2 + $0x38] sm:$0xff] (!%p165_p9)  ;;  %s444_s13 = sshll.u32 (!%p165_p9), %s186_s12, 3  ;;  %s806_s30 = scalar_lea.hbm (!%p165_p9), %s852_s4, %s449_s22 }
  0x11   : > { %523 = vmatprep.subr.bf16.mxu0 (!%p165_p9), %v656_v3  ;;  %528 = vmatpush3.bf16.msra.mxu1 (!%p165_p9), %v527_v9  ;;  %v533_v17 = vpack.c.bf16 (!%p165_p9), %v277_v15, %v276_v14  ;;  %v536_v20 = vpack.c.bf16 (!%p165_p9), %v279_v19, %v278_v18  ;;  %v280_v21 = vld [vmem:[%s850_s2 + $0x40] sm:$0xff] (!%p165_p9)  ;;  %v281_v22 = vld [vmem:[%s850_s2 + $0x48] sm:$0xff] (!%p165_p9)  ;;  %v282_v24 = vld [vmem:[%s850_s2 + $0x50] sm:$0xff] (!%p165_p9)  ;;  %s368_s5 = scalar_lea.sflag (!%p165_p9), [#allocation3], %s186_s12 }
  0x12   : > { %529 = vmatprep.subr.bf16.mxu1 (!%p165_p9), %v656_v3  ;;  %v539_v23 = vpack.c.bf16 (!%p165_p9), %v281_v22, %v280_v21  ;;  %v283_v25 = vld [vmem:[%s850_s2 + $0x58] sm:$0xff] (!%p165_p9)  ;;  %v284_v27 = vld [vmem:[%s850_s2 + $0x60] sm:$0xff] (!%p165_p9)  ;;  %v285_v28 = vld [vmem:[%s850_s2 + $0x68] sm:$0xff] (!%p165_p9) }
  0x13   : > { %v542_v26 = vpack.c.bf16 (!%p165_p9), %v283_v25, %v282_v24  ;;  %v545_v29 = vpack.c.bf16 (!%p165_p9), %v285_v28, %v284_v27  ;;  %v286_v30 = vld [vmem:[%s850_s2 + $0x70] sm:$0xff] (!%p165_p9)  ;;  %v287_v31 = vld [vmem:[%s850_s2 + $0x78] sm:$0xff] (!%p165_p9)  ;;  %v447_v35 = vld [vmem:[%s851_s3] ss:$0 sm:$0xff] (!%p165_p9) }
  0x14   : > { %525 = vmatpush3.bf16.msra.mxu0 (!%p165_p9), %v524_v12  ;;  %v548_v32 = vpack.c.bf16 (!%p165_p9), %v287_v31, %v286_v30 }
  0x15   : > { %s190_s23 = scalar_select %p189_p10, %s706_s19, 1  ;;  %531 = vmatpush3.bf16.msra.mxu1 %v530_v13 }
  0x16   : > { %532 = vmatprep.subr.bf16.mxu1 %v656_v3  ;;  %s659_s19 = smov [#allocation2]  }
  0x17   : > { %s445_s27 = sshll.u32 %s190_s23, 3  ;;  %s188_s23 = scalar_lea.vmem [#allocation2], %s444_s13 }
  0x18   : > { %s192_s8 = scalar_lea.vmem %s848_s0, %s445_s27  ;;  %s381_s27 = sshll.u32 %s188_s23, 4  ;;  %s808_s27 = int_to_ptr.vmem [resolvable:$true] %s381_s27 }
  0x19   : > { %v193_v16 = vld [vmem:[%s192_s8] sm:$0xff]  ;;  %534 = vmatpush3.bf16.msra.mxu1 %v533_v17  ;;  %s592_s6 = scalar_lea.vmem %s808_s27, 128  ;;  %s596_s7 = sshll.u32 %s659_s19, 4  ;;  %s597_s7 = int_to_ptr.vmem [resolvable:$false] %s596_s7 }
  0x1a   : > { %483 = vmatmul.mubr.msk.f32.vlgmr.msra.gmra.mrb[0].mxu0 %vm198_vm1, %v193_v16  ;;  %535 = vmatprep.subr.bf16.mxu1 %v656_v3  ;;  %p593_p11 = scmp.ne.s32.totalorder %s808_s27, %s592_s6  ;;  %s598_s8 = scalar_lea.vmem %s597_s7, 256 }
  0x1b   : > { %p599_p0 = scmp.lt.s32.totalorder %s808_s27, %s597_s7  ;;  %p600_p1 = scmp.lt.s32.totalorder %s598_s8, %s592_s6 }
  0x1c   : > { %p594_p12 = pnand %p593_p11, %p723_p5 }
  0x1d   : > { %537 = vmatpush3.bf16.msra.mxu1 %v536_v20  ;;  %p601_p2 = por %p600_p1, %p599_p0 }
  0x1e   : > { %538 = vmatprep.subr.bf16.mxu1 %v656_v3  ;;  %p595_p13 = pneg %p594_p12 }
  0x20   : > { %p602_p3 = pnand %p601_p2, %p595_p13 }
  0x21   : > { %540 = vmatpush3.bf16.msra.mxu1 %v539_v23 }
  0x22   : > { %541 = vmatprep.subr.bf16.mxu1 %v656_v3 }
  0x25   : > { %543 = vmatpush3.bf16.msra.mxu1 %v542_v26 }
  0x26   : > { %544 = vmatprep.subr.bf16.mxu1 %v656_v3 }
  0x29   : > { %546 = vmatpush3.bf16.msra.mxu1 %v545_v29 }
  0x2a   : > { %547 = vmatprep.subr.bf16.mxu1 %v656_v3 }
  0x2d   : > { %549 = vmatpush3.bf16.msra.mxu1 %v548_v32 }
  0xed   : > { %v268_v33 = vpop.f32.mrb[0].mxu0 }
  0xee   : > { %v484_v34 = vpop.f32.mrb[1].mxu0  ;;  %518 = vmatmul.mubr.f32.vlgmr.msra.gmra.mrb[0].mxu1 %v268_v33 }
 0x1c1   : > { %v361_v36 = vpop.f32.mrb[0].mxu1 }
 0x1c2   : > { %v362_v37 = vadd.f32 %v447_v35, %v361_v36  ;;  %v519_v38 = vpop.f32.mrb[1].mxu1 }
 0x1c4   : > { %366 = vst.msk [vmem:[%s188_s23] sm:$0xff] %vm365_vm2, %v362_v37 }
 0x1c5   : > { %605 = shalt.err (!%p602_p3)
}
 0x1c6   : > { %s606_s9 = scalar_lea.hbm %s806_s30, 128  ;;  %s610_s12 = scalar_lea.hbm %s852_s4, 256 }
 0x1c7   : > { %p607_p4 = scmp.ne.s32.totalorder %s806_s30, %s606_s9  ;;  %p611_p9 = scmp.lt.u32.totalorder %s806_s30, %s852_s4 }
 0x1c8   : > { %p612_p10 = scmp.lt.u32.totalorder %s610_s12, %s606_s9  ;;  %p614_p12 = scmp.lt.u32.totalorder %s606_s9, %s806_s30 }
 0x1c9   : > { %p608_p7 = pnand %p607_p4, %p723_p5 }
 0x1ca   : > { %p613_p11 = por %p612_p10, %p611_p9 }
 0x1cb   : > { %p609_p8 = pneg %p608_p7 }
 0x1cc   : > { %p615_p13 = por %p614_p12, %p613_p11 }
 0x1ce   : > { %p616_p0 = pnand %p615_p13, %p609_p8 }
 0x1d0   : > { %619 = shalt.err (!%p616_p0)
}
 0x1d1   : > { %550 = dma.vmem_to_hbm [thread:$0]  (%p723_p5), %s808_s27, 128, %s806_s30, %s368_s5  }
 0x1d2 PF: > { %p556_p1 = scmp.ge.s32.totalorder %s654_s18, 2  ;;  %s393_s20 = sand.u32 1, %s642_s15  }
 0x1d3   : > { %s394_s22 = scalar_lea.sflag [#allocation3], %s393_s20 }
 0x1d4   : > { %p553_p2 = pnand %p556_p1, %p727_p6 }
 0x1d6   : > { %637 = dma.done.wait (!%p553_p2), %s394_s22, 128  }
 0x1d7   : > { %639 = vsyncadd (!%p553_p2), %s394_s22, 4294967168  ;;  %p14_p3 = scmp.ge.s32.totalorder %s710_s21, 4   ;;  %s855_s15 = smov %s646_s16 }
 0x1d8   : > { %s856_s16 = smov %s650_s17  ;;  %s857_s17 = smov %s721_s24 }
 0x1d9   : > { %s858_s18 = smov %s710_s21  ;;  %16 = sbr.rel (!%p14_p3) target bundleno = 3 (0x3), region = 71 }
 0x1e0   :  { %399 = vsyncpa [#allocation3], 1 }
 0x1e1   :  { %401 = vsyncpa [#allocation3 + $0x1], 1 }

</bundles_post_ra>
